<compile_context>
chip_gen: v7x
topology: tpu7x:2x2x1
jax: 0.10.0
libtpu: 0.0.40
codegen_flags: <defaults>
</compile_context>

<pallas_src>
import functools

import jax
import jax.numpy as jnp
from jax.experimental import pallas as pl
from jax.experimental.pallas import tpu as pltpu


def rnn_fused_kernel(ids_ref, emb_ref, gamma_ref, beta_ref, wih_ref, whh_ref, b_ref,
                     wfc_ref, bfc_ref, out_ref, xg_ref, *, ln_eps, seq_len, batch):
    """Single-invocation fused forward.

    ids_ref: (B*T,) int32 in SMEM (scalar prefetch), batch-major: ids[b*T + t]
    emb_ref: (V, E)  embedding table (row 0 is the zeroed padding_idx row)
    b_ref:   (1, H)  pre-summed b_ih + b_hh
    out_ref: (B, O)  logits
    xg_ref:  (T*Bp, E) VMEM scratch; Bp = batch padded to 8 sublanes (time-major rows)
    """
    T, B = seq_len, batch
    Bp = xg_ref.shape[0] // T                                  # sublane-padded batch (mult of 8)

    # ---- Fused embedding gather into the sublane-padded staging buffer ----
    # Zero once so pad rows are deterministic (they never reach out_ref: every later op is
    # row-independent and the final store slices the first B rows).
    xg_ref[...] = jnp.zeros_like(xg_ref)
    for t in range(T):                                         # static unroll (T*B tiny)
        for b in range(B):
            idx = ids_ref[b * T + t]                           # scalar SMEM read
            row = t * Bp + b
            xg_ref[row:row + 1, :] = emb_ref[pl.ds(idx, 1), :] # dynamic-row VMEM load

    # ---- LayerNorm over embedding_dim for ALL T*Bp rows at once (hoisted) ----
    x = xg_ref[...]                                            # (T*Bp, E) f32
    mean = jnp.mean(x, axis=-1, keepdims=True)
    cent = x - mean
    var = jnp.mean(cent * cent, axis=-1, keepdims=True)
    xn = cent * jax.lax.rsqrt(var + ln_eps)
    xn = xn * gamma_ref[...] + beta_ref[...]                   # (1,E) broadcast, one-shot

    # ---- Input projection for ALL time steps: one (T*Bp,E)@(E,H) MXU op + fused bias ----
    xp = jnp.dot(xn, wih_ref[...], preferred_element_type=jnp.float32) + b_ref[...]

    # ---- Sequential Elman recurrence: only h @ W_hh + add + tanh on the critical path ----
    whh = whh_ref[...]                                         # hoisted, loop-invariant
    h = jnp.tanh(xp[0:Bp, :])                                  # peeled t=0 (h0 == 0)
    for t in range(1, T):                                      # fully unrolled, 8-aligned slices
        h = jnp.tanh(xp[t * Bp:(t + 1) * Bp, :]
                     + jnp.dot(h, whh, preferred_element_type=jnp.float32))

    # ---- Dropout(0.3) is identity in eval mode; final Linear; keep only real batch rows ----
    logits = jnp.dot(h, wfc_ref[...], preferred_element_type=jnp.float32) + bfc_ref[...]
    out_ref[...] = logits[:B, :].astype(out_ref.dtype)


def rnn_forward_pallas(x_ids, params, *, ln_eps=1e-5):
    """x_ids: (B, T) int32 token ids. Returns logits (B, O). Dropout is identity (eval)."""
    B, T = x_ids.shape
    V, E = params["embedding"].shape
    H = params["w_ih"].shape[1]
    O = params["w_fc"].shape[1]
    Bp = ((B + 7) // 8) * 8                                    # sublane-padded batch

    ids = x_ids.reshape(-1).astype(jnp.int32)                  # batch-major flatten (contiguous)

    kernel = functools.partial(rnn_fused_kernel, ln_eps=ln_eps, seq_len=T, batch=B)

    def full(shape):
        zeros = (0,) * len(shape)
        # index_map receives (grid_idx, *scalar_prefetch_refs)
        return pl.BlockSpec(shape, lambda i, ids_ref: zeros)

    return pl.pallas_call(
        kernel,
        out_shape=jax.ShapeDtypeStruct((B, O), jnp.float32),
        grid_spec=pltpu.PrefetchScalarGridSpec(
            num_scalar_prefetch=1,                             # ids -> SMEM, no XLA gather
            grid=(1,),                                         # grid collapsed: one invocation
            in_specs=[
                full((V, E)),                                  # embedding table
                full((1, E)),                                  # LayerNorm gamma
                full((1, E)),                                  # LayerNorm beta
                full((E, H)),                                  # W_ih (pre-transposed)
                full((H, H)),                                  # W_hh (pre-transposed)
                full((1, H)),                                  # b_ih + b_hh (pre-summed at init)
                full((H, O)),                                  # W_fc (pre-transposed)
                full((1, O)),                                  # b_fc
            ],
            out_specs=full((B, O)),
            scratch_shapes=[pltpu.VMEM((T * Bp, E), jnp.float32)],  # gathered, batch-padded slab
        ),
        compiler_params=pltpu.CompilerParams(
            dimension_semantics=("arbitrary",),
        ),
    )(ids, params["embedding"],
      params["ln_gamma"], params["ln_beta"],
      params["w_ih"], params["w_hh"], params["b_rnn"],
      params["w_fc"], params["b_fc"])


def init_params(key, vocab_size, embedding_dim, hidden_dim, output_size):
    ks = jax.random.split(key, 7)
    emb = jax.random.normal(ks[0], (vocab_size, embedding_dim), jnp.float32)
    emb = emb.at[0].set(0.0)                                   # padding_idx=0 row zeroed
    k_h = 1.0 / jnp.sqrt(hidden_dim)
    params = {
        "embedding": emb,
        "ln_gamma": jnp.ones((1, embedding_dim), jnp.float32),
        "ln_beta": jnp.zeros((1, embedding_dim), jnp.float32),
        # stored pre-transposed relative to PyTorch: (in_features, out_features)
        "w_ih": jax.random.uniform(ks[1], (embedding_dim, hidden_dim), jnp.float32, -k_h, k_h),
        "w_hh": jax.random.uniform(ks[2], (hidden_dim, hidden_dim), jnp.float32, -k_h, k_h),
        "b_ih": jax.random.uniform(ks[3], (1, hidden_dim), jnp.float32, -k_h, k_h),
        "b_hh": jax.random.uniform(ks[4], (1, hidden_dim), jnp.float32, -k_h, k_h),
        "w_fc": jax.random.uniform(ks[5], (hidden_dim, output_size), jnp.float32, -k_h, k_h),
        "b_fc": jax.random.uniform(ks[6], (1, output_size), jnp.float32, -k_h, k_h),
    }
    # Pre-sum the two RNN biases ONCE at init (removes a per-call dispatched XLA add).
    params["b_rnn"] = params["b_ih"] + params["b_hh"]
    return params


def reference_forward(x_ids, params, ln_eps=1e-5):
    """Pure-JAX reference for correctness check (mirrors the PyTorch module in eval mode)."""
    emb = params["embedding"][x_ids]                           # (B, T, E)
    mean = jnp.mean(emb, axis=-1, keepdims=True)
    var = jnp.mean((emb - mean) ** 2, axis=-1, keepdims=True)
    xn = (emb - mean) / jnp.sqrt(var + ln_eps)
    xn = xn * params["ln_gamma"][0] + params["ln_beta"][0]
    B, T, E = xn.shape
    H = params["w_ih"].shape[1]
    h = jnp.zeros((B, H), jnp.float32)
    for t in range(T):
        h = jnp.tanh(xn[:, t, :] @ params["w_ih"] + params["b_ih"]
                     + h @ params["w_hh"] + params["b_hh"])
    return h @ params["w_fc"] + params["b_fc"]


if __name__ == "__main__":
    vocab_size, embedding_dim, hidden_dim, output_size = 30, 16, 32, 8
    batch, seq_len = 2, 8

    key = jax.random.PRNGKey(0)
    k_param, k_data = jax.random.split(key)
    params = init_params(k_param, vocab_size, embedding_dim, hidden_dim, output_size)

    x_ids = jax.random.randint(k_data, (batch, seq_len), 0, vocab_size, dtype=jnp.int32)

    logits = rnn_forward_pallas(x_ids, params)
    logits = jax.block_until_ready(logits)

    ref = reference_forward(x_ids, params)
    assert logits.shape == (batch, output_size)
    assert jnp.allclose(logits, ref, atol=1e-4, rtol=1e-4), "mismatch vs reference"

    print("KERNEL_OK")
</pallas_src>

<mosaic_0001>
module attributes {stable_mosaic.version = 11 : i64} {
  func.func @rnn_fused_kernel(%arg0: i32, %arg1: memref<16xi32, #tpu.memory_space<smem>>, %arg2: memref<30x16xf32, #tpu.memory_space<vmem>>, %arg3: memref<1x16xf32, #tpu.memory_space<vmem>>, %arg4: memref<1x16xf32, #tpu.memory_space<vmem>>, %arg5: memref<16x32xf32, #tpu.memory_space<vmem>>, %arg6: memref<32x32xf32, #tpu.memory_space<vmem>>, %arg7: memref<1x32xf32, #tpu.memory_space<vmem>>, %arg8: memref<32x8xf32, #tpu.memory_space<vmem>>, %arg9: memref<1x8xf32, #tpu.memory_space<vmem>>, %arg10: memref<2x8xf32, #tpu.memory_space<vmem>>, %arg11: memref<64x16xf32, #tpu.memory_space<vmem>>) attributes {dimension_semantics = [#tpu.dimension_semantics<arbitrary>], iteration_bounds = array<i64: 1>, scalar_prefetch = 1 : i64, scratch_operands = 1 : i64, tpu.core_type = #tpu.core_type<tc>, window_params = [{pipeline_mode = #tpu.pipeline_mode<synchronous>, transform_indices = @transform_0, window_bounds = array<i64: 30, 16>}, {pipeline_mode = #tpu.pipeline_mode<synchronous>, transform_indices = @transform_1, window_bounds = array<i64: 1, 16>}, {pipeline_mode = #tpu.pipeline_mode<synchronous>, transform_indices = @transform_2, window_bounds = array<i64: 1, 16>}, {pipeline_mode = #tpu.pipeline_mode<synchronous>, transform_indices = @transform_3, window_bounds = array<i64: 16, 32>}, {pipeline_mode = #tpu.pipeline_mode<synchronous>, transform_indices = @transform_4, window_bounds = array<i64: 32, 32>}, {pipeline_mode = #tpu.pipeline_mode<synchronous>, transform_indices = @transform_5, window_bounds = array<i64: 1, 32>}, {pipeline_mode = #tpu.pipeline_mode<synchronous>, transform_indices = @transform_6, window_bounds = array<i64: 32, 8>}, {pipeline_mode = #tpu.pipeline_mode<synchronous>, transform_indices = @transform_7, window_bounds = array<i64: 1, 8>}, {pipeline_mode = #tpu.pipeline_mode<synchronous>, transform_indices = @transform_8, window_bounds = array<i64: 2, 8>}]} {
    %cst = arith.constant 0.000000e+00 : f32
    %0 = vector.broadcast %cst : f32 to vector<64x16xf32>
    %c0 = arith.constant 0 : index
    %c0_0 = arith.constant 0 : index
    %1 = vector.load %arg11[%c0, %c0_0] : memref<64x16xf32, #tpu.memory_space<vmem>>, vector<64x16xf32>
    tpu.vector_store %arg11[%c0, %c0_0], %0 {strides = array<i32>} : memref<64x16xf32, #tpu.memory_space<vmem>>, vector<64x16xf32>,
    %c0_1 = arith.constant 0 : index
    %2 = memref.load %arg1[%c0_1] : memref<16xi32, #tpu.memory_space<smem>>
    %3 = arith.index_cast %2 : i32 to index
    %c0_2 = arith.constant 0 : index
    %4 = vector.load %arg2[%3, %c0_2] : memref<30x16xf32, #tpu.memory_space<vmem>>, vector<1x16xf32>
    %c0_3 = arith.constant 0 : index
    %c0_4 = arith.constant 0 : index
    %5 = vector.load %arg11[%c0_3, %c0_4] : memref<64x16xf32, #tpu.memory_space<vmem>>, vector<1x16xf32>
    tpu.vector_store %arg11[%c0_3, %c0_4], %4 {strides = array<i32>} : memref<64x16xf32, #tpu.memory_space<vmem>>, vector<1x16xf32>,
    %c8 = arith.constant 8 : index
    %6 = memref.load %arg1[%c8] : memref<16xi32, #tpu.memory_space<smem>>
    %7 = arith.index_cast %6 : i32 to index
    %c0_5 = arith.constant 0 : index
    %8 = vector.load %arg2[%7, %c0_5] : memref<30x16xf32, #tpu.memory_space<vmem>>, vector<1x16xf32>
    %c1 = arith.constant 1 : index
    %c0_6 = arith.constant 0 : index
    %9 = vector.load %arg11[%c1, %c0_6] : memref<64x16xf32, #tpu.memory_space<vmem>>, vector<1x16xf32>
    tpu.vector_store %arg11[%c1, %c0_6], %8 {strides = array<i32>} : memref<64x16xf32, #tpu.memory_space<vmem>>, vector<1x16xf32>,
    %c1_7 = arith.constant 1 : index
    %10 = memref.load %arg1[%c1_7] : memref<16xi32, #tpu.memory_space<smem>>
    %11 = arith.index_cast %10 : i32 to index
    %c0_8 = arith.constant 0 : index
    %12 = vector.load %arg2[%11, %c0_8] : memref<30x16xf32, #tpu.memory_space<vmem>>, vector<1x16xf32>
    %c8_9 = arith.constant 8 : index
    %c0_10 = arith.constant 0 : index
    %13 = vector.load %arg11[%c8_9, %c0_10] : memref<64x16xf32, #tpu.memory_space<vmem>>, vector<1x16xf32>
    tpu.vector_store %arg11[%c8_9, %c0_10], %12 {strides = array<i32>} : memref<64x16xf32, #tpu.memory_space<vmem>>, vector<1x16xf32>,
    %c9 = arith.constant 9 : index
    %14 = memref.load %arg1[%c9] : memref<16xi32, #tpu.memory_space<smem>>
    %15 = arith.index_cast %14 : i32 to index
    %c0_11 = arith.constant 0 : index
    %16 = vector.load %arg2[%15, %c0_11] : memref<30x16xf32, #tpu.memory_space<vmem>>, vector<1x16xf32>
    %c9_12 = arith.constant 9 : index
    %c0_13 = arith.constant 0 : index
    %17 = vector.load %arg11[%c9_12, %c0_13] : memref<64x16xf32, #tpu.memory_space<vmem>>, vector<1x16xf32>
    tpu.vector_store %arg11[%c9_12, %c0_13], %16 {strides = array<i32>} : memref<64x16xf32, #tpu.memory_space<vmem>>, vector<1x16xf32>,
    %c2 = arith.constant 2 : index
    %18 = memref.load %arg1[%c2] : memref<16xi32, #tpu.memory_space<smem>>
    %19 = arith.index_cast %18 : i32 to index
    %c0_14 = arith.constant 0 : index
    %20 = vector.load %arg2[%19, %c0_14] : memref<30x16xf32, #tpu.memory_space<vmem>>, vector<1x16xf32>
    %c16 = arith.constant 16 : index
    %c0_15 = arith.constant 0 : index
    %21 = vector.load %arg11[%c16, %c0_15] : memref<64x16xf32, #tpu.memory_space<vmem>>, vector<1x16xf32>
    tpu.vector_store %arg11[%c16, %c0_15], %20 {strides = array<i32>} : memref<64x16xf32, #tpu.memory_space<vmem>>, vector<1x16xf32>,
    %c10 = arith.constant 10 : index
    %22 = memref.load %arg1[%c10] : memref<16xi32, #tpu.memory_space<smem>>
    %23 = arith.index_cast %22 : i32 to index
    %c0_16 = arith.constant 0 : index
    %24 = vector.load %arg2[%23, %c0_16] : memref<30x16xf32, #tpu.memory_space<vmem>>, vector<1x16xf32>
    %c17 = arith.constant 17 : index
    %c0_17 = arith.constant 0 : index
    %25 = vector.load %arg11[%c17, %c0_17] : memref<64x16xf32, #tpu.memory_space<vmem>>, vector<1x16xf32>
    tpu.vector_store %arg11[%c17, %c0_17], %24 {strides = array<i32>} : memref<64x16xf32, #tpu.memory_space<vmem>>, vector<1x16xf32>,
    %c3 = arith.constant 3 : index
    %26 = memref.load %arg1[%c3] : memref<16xi32, #tpu.memory_space<smem>>
    %27 = arith.index_cast %26 : i32 to index
    %c0_18 = arith.constant 0 : index
    %28 = vector.load %arg2[%27, %c0_18] : memref<30x16xf32, #tpu.memory_space<vmem>>, vector<1x16xf32>
    %c24 = arith.constant 24 : index
    %c0_19 = arith.constant 0 : index
    %29 = vector.load %arg11[%c24, %c0_19] : memref<64x16xf32, #tpu.memory_space<vmem>>, vector<1x16xf32>
    tpu.vector_store %arg11[%c24, %c0_19], %28 {strides = array<i32>} : memref<64x16xf32, #tpu.memory_space<vmem>>, vector<1x16xf32>,
    %c11 = arith.constant 11 : index
    %30 = memref.load %arg1[%c11] : memref<16xi32, #tpu.memory_space<smem>>
    %31 = arith.index_cast %30 : i32 to index
    %c0_20 = arith.constant 0 : index
    %32 = vector.load %arg2[%31, %c0_20] : memref<30x16xf32, #tpu.memory_space<vmem>>, vector<1x16xf32>
    %c25 = arith.constant 25 : index
    %c0_21 = arith.constant 0 : index
    %33 = vector.load %arg11[%c25, %c0_21] : memref<64x16xf32, #tpu.memory_space<vmem>>, vector<1x16xf32>
    tpu.vector_store %arg11[%c25, %c0_21], %32 {strides = array<i32>} : memref<64x16xf32, #tpu.memory_space<vmem>>, vector<1x16xf32>,
    %c4 = arith.constant 4 : index
    %34 = memref.load %arg1[%c4] : memref<16xi32, #tpu.memory_space<smem>>
    %35 = arith.index_cast %34 : i32 to index
    %c0_22 = arith.constant 0 : index
    %36 = vector.load %arg2[%35, %c0_22] : memref<30x16xf32, #tpu.memory_space<vmem>>, vector<1x16xf32>
    %c32 = arith.constant 32 : index
    %c0_23 = arith.constant 0 : index
    %37 = vector.load %arg11[%c32, %c0_23] : memref<64x16xf32, #tpu.memory_space<vmem>>, vector<1x16xf32>
    tpu.vector_store %arg11[%c32, %c0_23], %36 {strides = array<i32>} : memref<64x16xf32, #tpu.memory_space<vmem>>, vector<1x16xf32>,
    %c12 = arith.constant 12 : index
    %38 = memref.load %arg1[%c12] : memref<16xi32, #tpu.memory_space<smem>>
    %39 = arith.index_cast %38 : i32 to index
    %c0_24 = arith.constant 0 : index
    %40 = vector.load %arg2[%39, %c0_24] : memref<30x16xf32, #tpu.memory_space<vmem>>, vector<1x16xf32>
    %c33 = arith.constant 33 : index
    %c0_25 = arith.constant 0 : index
    %41 = vector.load %arg11[%c33, %c0_25] : memref<64x16xf32, #tpu.memory_space<vmem>>, vector<1x16xf32>
    tpu.vector_store %arg11[%c33, %c0_25], %40 {strides = array<i32>} : memref<64x16xf32, #tpu.memory_space<vmem>>, vector<1x16xf32>,
    %c5 = arith.constant 5 : index
    %42 = memref.load %arg1[%c5] : memref<16xi32, #tpu.memory_space<smem>>
    %43 = arith.index_cast %42 : i32 to index
    %c0_26 = arith.constant 0 : index
    %44 = vector.load %arg2[%43, %c0_26] : memref<30x16xf32, #tpu.memory_space<vmem>>, vector<1x16xf32>
    %c40 = arith.constant 40 : index
    %c0_27 = arith.constant 0 : index
    %45 = vector.load %arg11[%c40, %c0_27] : memref<64x16xf32, #tpu.memory_space<vmem>>, vector<1x16xf32>
    tpu.vector_store %arg11[%c40, %c0_27], %44 {strides = array<i32>} : memref<64x16xf32, #tpu.memory_space<vmem>>, vector<1x16xf32>,
    %c13 = arith.constant 13 : index
    %46 = memref.load %arg1[%c13] : memref<16xi32, #tpu.memory_space<smem>>
    %47 = arith.index_cast %46 : i32 to index
    %c0_28 = arith.constant 0 : index
    %48 = vector.load %arg2[%47, %c0_28] : memref<30x16xf32, #tpu.memory_space<vmem>>, vector<1x16xf32>
    %c41 = arith.constant 41 : index
    %c0_29 = arith.constant 0 : index
    %49 = vector.load %arg11[%c41, %c0_29] : memref<64x16xf32, #tpu.memory_space<vmem>>, vector<1x16xf32>
    tpu.vector_store %arg11[%c41, %c0_29], %48 {strides = array<i32>} : memref<64x16xf32, #tpu.memory_space<vmem>>, vector<1x16xf32>,
    %c6 = arith.constant 6 : index
    %50 = memref.load %arg1[%c6] : memref<16xi32, #tpu.memory_space<smem>>
    %51 = arith.index_cast %50 : i32 to index
    %c0_30 = arith.constant 0 : index
    %52 = vector.load %arg2[%51, %c0_30] : memref<30x16xf32, #tpu.memory_space<vmem>>, vector<1x16xf32>
    %c48 = arith.constant 48 : index
    %c0_31 = arith.constant 0 : index
    %53 = vector.load %arg11[%c48, %c0_31] : memref<64x16xf32, #tpu.memory_space<vmem>>, vector<1x16xf32>
    tpu.vector_store %arg11[%c48, %c0_31], %52 {strides = array<i32>} : memref<64x16xf32, #tpu.memory_space<vmem>>, vector<1x16xf32>,
    %c14 = arith.constant 14 : index
    %54 = memref.load %arg1[%c14] : memref<16xi32, #tpu.memory_space<smem>>
    %55 = arith.index_cast %54 : i32 to index
    %c0_32 = arith.constant 0 : index
    %56 = vector.load %arg2[%55, %c0_32] : memref<30x16xf32, #tpu.memory_space<vmem>>, vector<1x16xf32>
    %c49 = arith.constant 49 : index
    %c0_33 = arith.constant 0 : index
    %57 = vector.load %arg11[%c49, %c0_33] : memref<64x16xf32, #tpu.memory_space<vmem>>, vector<1x16xf32>
    tpu.vector_store %arg11[%c49, %c0_33], %56 {strides = array<i32>} : memref<64x16xf32, #tpu.memory_space<vmem>>, vector<1x16xf32>,
    %c7 = arith.constant 7 : index
    %58 = memref.load %arg1[%c7] : memref<16xi32, #tpu.memory_space<smem>>
    %59 = arith.index_cast %58 : i32 to index
    %c0_34 = arith.constant 0 : index
    %60 = vector.load %arg2[%59, %c0_34] : memref<30x16xf32, #tpu.memory_space<vmem>>, vector<1x16xf32>
    %c56 = arith.constant 56 : index
    %c0_35 = arith.constant 0 : index
    %61 = vector.load %arg11[%c56, %c0_35] : memref<64x16xf32, #tpu.memory_space<vmem>>, vector<1x16xf32>
    tpu.vector_store %arg11[%c56, %c0_35], %60 {strides = array<i32>} : memref<64x16xf32, #tpu.memory_space<vmem>>, vector<1x16xf32>,
    %c15 = arith.constant 15 : index
    %62 = memref.load %arg1[%c15] : memref<16xi32, #tpu.memory_space<smem>>
    %63 = arith.index_cast %62 : i32 to index
    %c0_36 = arith.constant 0 : index
    %64 = vector.load %arg2[%63, %c0_36] : memref<30x16xf32, #tpu.memory_space<vmem>>, vector<1x16xf32>
    %c57 = arith.constant 57 : index
    %c0_37 = arith.constant 0 : index
    %65 = vector.load %arg11[%c57, %c0_37] : memref<64x16xf32, #tpu.memory_space<vmem>>, vector<1x16xf32>
    tpu.vector_store %arg11[%c57, %c0_37], %64 {strides = array<i32>} : memref<64x16xf32, #tpu.memory_space<vmem>>, vector<1x16xf32>,
    %c0_38 = arith.constant 0 : index
    %c0_39 = arith.constant 0 : index
    %66 = vector.load %arg11[%c0_38, %c0_39] : memref<64x16xf32, #tpu.memory_space<vmem>>, vector<64x16xf32>
    %cst_40 = arith.constant dense<0.000000e+00> : vector<64xf32>
    %67 = vector.multi_reduction <add>, %66, %cst_40 [1] : vector<64x16xf32> to vector<64xf32>
    %68 = vector.shape_cast %67 : vector<64xf32> to vector<64x1xf32>
    %cst_41 = arith.constant 1.600000e+01 : f32
    %69 = vector.broadcast %cst_41 : f32 to vector<64x1xf32>
    %70 = arith.divf %68, %69 : vector<64x1xf32>
    %71 = vector.broadcast %70 : vector<64x1xf32> to vector<64x16xf32>
    %72 = arith.subf %66, %71 : vector<64x16xf32>
    %73 = arith.mulf %72, %72 : vector<64x16xf32>
    %cst_42 = arith.constant dense<0.000000e+00> : vector<64xf32>
    %74 = vector.multi_reduction <add>, %73, %cst_42 [1] : vector<64x16xf32> to vector<64xf32>
    %75 = vector.shape_cast %74 : vector<64xf32> to vector<64x1xf32>
    %cst_43 = arith.constant 1.600000e+01 : f32
    %76 = vector.broadcast %cst_43 : f32 to vector<64x1xf32>
    %77 = arith.divf %75, %76 : vector<64x1xf32>
    %cst_44 = arith.constant 9.99999974E-6 : f32
    %78 = vector.broadcast %cst_44 : f32 to vector<64x1xf32>
    %79 = arith.addf %77, %78 : vector<64x1xf32>
    %80 = math.rsqrt %79 : vector<64x1xf32>
    %81 = vector.broadcast %80 : vector<64x1xf32> to vector<64x16xf32>
    %82 = arith.mulf %72, %81 : vector<64x16xf32>
    %c0_45 = arith.constant 0 : index
    %c0_46 = arith.constant 0 : index
    %83 = vector.load %arg3[%c0_45, %c0_46] : memref<1x16xf32, #tpu.memory_space<vmem>>, vector<1x16xf32>
    %84 = vector.broadcast %83 : vector<1x16xf32> to vector<64x16xf32>
    %85 = arith.mulf %82, %84 : vector<64x16xf32>
    %c0_47 = arith.constant 0 : index
    %c0_48 = arith.constant 0 : index
    %86 = vector.load %arg4[%c0_47, %c0_48] : memref<1x16xf32, #tpu.memory_space<vmem>>, vector<1x16xf32>
    %87 = vector.broadcast %86 : vector<1x16xf32> to vector<64x16xf32>
    %88 = arith.addf %85, %87 : vector<64x16xf32>
    %c0_49 = arith.constant 0 : index
    %c0_50 = arith.constant 0 : index
    %89 = vector.load %arg5[%c0_49, %c0_50] : memref<16x32xf32, #tpu.memory_space<vmem>>, vector<16x32xf32>
    %cst_51 = arith.constant dense<0.000000e+00> : vector<64x32xf32>
    %90 = tpu.matmul %88, %89, %cst_51 {dimension_numbers = #tpu.dot_dimension_numbers<[1], [0], [0], [1], [0, 0, 1, 1], [], []>} : vector<64x16xf32>, vector<16x32xf32>, vector<64x32xf32> -> vector<64x32xf32>
    %c0_52 = arith.constant 0 : index
    %c0_53 = arith.constant 0 : index
    %91 = vector.load %arg7[%c0_52, %c0_53] : memref<1x32xf32, #tpu.memory_space<vmem>>, vector<1x32xf32>
    %92 = vector.broadcast %91 : vector<1x32xf32> to vector<64x32xf32>
    %93 = arith.addf %90, %92 : vector<64x32xf32>
    %c0_54 = arith.constant 0 : index
    %c0_55 = arith.constant 0 : index
    %94 = vector.load %arg6[%c0_54, %c0_55] : memref<32x32xf32, #tpu.memory_space<vmem>>, vector<32x32xf32>
    %95 = vector.extract_strided_slice %93 {offsets = [0, 0], sizes = [8, 32], strides = [1, 1]} : vector<64x32xf32> to vector<8x32xf32>
    %96 = math.tanh %95 : vector<8x32xf32>
    %97 = vector.extract_strided_slice %93 {offsets = [8, 0], sizes = [8, 32], strides = [1, 1]} : vector<64x32xf32> to vector<8x32xf32>
    %cst_56 = arith.constant dense<0.000000e+00> : vector<8x32xf32>
    %98 = tpu.matmul %96, %94, %cst_56 {dimension_numbers = #tpu.dot_dimension_numbers<[1], [0], [0], [1], [0, 0, 1, 1], [], []>} : vector<8x32xf32>, vector<32x32xf32>, vector<8x32xf32> -> vector<8x32xf32>
    %99 = arith.addf %97, %98 : vector<8x32xf32>
    %100 = math.tanh %99 : vector<8x32xf32>
    %101 = vector.extract_strided_slice %93 {offsets = [16, 0], sizes = [8, 32], strides = [1, 1]} : vector<64x32xf32> to vector<8x32xf32>
    %cst_57 = arith.constant dense<0.000000e+00> : vector<8x32xf32>
    %102 = tpu.matmul %100, %94, %cst_57 {dimension_numbers = #tpu.dot_dimension_numbers<[1], [0], [0], [1], [0, 0, 1, 1], [], []>} : vector<8x32xf32>, vector<32x32xf32>, vector<8x32xf32> -> vector<8x32xf32>
    %103 = arith.addf %101, %102 : vector<8x32xf32>
    %104 = math.tanh %103 : vector<8x32xf32>
    %105 = vector.extract_strided_slice %93 {offsets = [24, 0], sizes = [8, 32], strides = [1, 1]} : vector<64x32xf32> to vector<8x32xf32>
    %cst_58 = arith.constant dense<0.000000e+00> : vector<8x32xf32>
    %106 = tpu.matmul %104, %94, %cst_58 {dimension_numbers = #tpu.dot_dimension_numbers<[1], [0], [0], [1], [0, 0, 1, 1], [], []>} : vector<8x32xf32>, vector<32x32xf32>, vector<8x32xf32> -> vector<8x32xf32>
    %107 = arith.addf %105, %106 : vector<8x32xf32>
    %108 = math.tanh %107 : vector<8x32xf32>
    %109 = vector.extract_strided_slice %93 {offsets = [32, 0], sizes = [8, 32], strides = [1, 1]} : vector<64x32xf32> to vector<8x32xf32>
    %cst_59 = arith.constant dense<0.000000e+00> : vector<8x32xf32>
    %110 = tpu.matmul %108, %94, %cst_59 {dimension_numbers = #tpu.dot_dimension_numbers<[1], [0], [0], [1], [0, 0, 1, 1], [], []>} : vector<8x32xf32>, vector<32x32xf32>, vector<8x32xf32> -> vector<8x32xf32>
    %111 = arith.addf %109, %110 : vector<8x32xf32>
    %112 = math.tanh %111 : vector<8x32xf32>
    %113 = vector.extract_strided_slice %93 {offsets = [40, 0], sizes = [8, 32], strides = [1, 1]} : vector<64x32xf32> to vector<8x32xf32>
    %cst_60 = arith.constant dense<0.000000e+00> : vector<8x32xf32>
    %114 = tpu.matmul %112, %94, %cst_60 {dimension_numbers = #tpu.dot_dimension_numbers<[1], [0], [0], [1], [0, 0, 1, 1], [], []>} : vector<8x32xf32>, vector<32x32xf32>, vector<8x32xf32> -> vector<8x32xf32>
    %115 = arith.addf %113, %114 : vector<8x32xf32>
    %116 = math.tanh %115 : vector<8x32xf32>
    %117 = vector.extract_strided_slice %93 {offsets = [48, 0], sizes = [8, 32], strides = [1, 1]} : vector<64x32xf32> to vector<8x32xf32>
    %cst_61 = arith.constant dense<0.000000e+00> : vector<8x32xf32>
    %118 = tpu.matmul %116, %94, %cst_61 {dimension_numbers = #tpu.dot_dimension_numbers<[1], [0], [0], [1], [0, 0, 1, 1], [], []>} : vector<8x32xf32>, vector<32x32xf32>, vector<8x32xf32> -> vector<8x32xf32>
    %119 = arith.addf %117, %118 : vector<8x32xf32>
    %120 = math.tanh %119 : vector<8x32xf32>
    %121 = vector.extract_strided_slice %93 {offsets = [56, 0], sizes = [8, 32], strides = [1, 1]} : vector<64x32xf32> to vector<8x32xf32>
    %cst_62 = arith.constant dense<0.000000e+00> : vector<8x32xf32>
    %122 = tpu.matmul %120, %94, %cst_62 {dimension_numbers = #tpu.dot_dimension_numbers<[1], [0], [0], [1], [0, 0, 1, 1], [], []>} : vector<8x32xf32>, vector<32x32xf32>, vector<8x32xf32> -> vector<8x32xf32>
    %123 = arith.addf %121, %122 : vector<8x32xf32>
    %124 = math.tanh %123 : vector<8x32xf32>
    %c0_63 = arith.constant 0 : index
    %c0_64 = arith.constant 0 : index
    %125 = vector.load %arg8[%c0_63, %c0_64] : memref<32x8xf32, #tpu.memory_space<vmem>>, vector<32x8xf32>
    %cst_65 = arith.constant dense<0.000000e+00> : vector<8x8xf32>
    %126 = tpu.matmul %124, %125, %cst_65 {dimension_numbers = #tpu.dot_dimension_numbers<[1], [0], [0], [1], [0, 0, 1, 1], [], []>} : vector<8x32xf32>, vector<32x8xf32>, vector<8x8xf32> -> vector<8x8xf32>
    %c0_66 = arith.constant 0 : index
    %c0_67 = arith.constant 0 : index
    %127 = vector.load %arg9[%c0_66, %c0_67] : memref<1x8xf32, #tpu.memory_space<vmem>>, vector<1x8xf32>
    %128 = vector.broadcast %127 : vector<1x8xf32> to vector<8x8xf32>
    %129 = arith.addf %126, %128 : vector<8x8xf32>
    %130 = vector.extract_strided_slice %129 {offsets = [0, 0], sizes = [2, 8], strides = [1, 1]} : vector<8x8xf32> to vector<2x8xf32>
    %c0_68 = arith.constant 0 : index
    %c0_69 = arith.constant 0 : index
    %131 = vector.load %arg10[%c0_68, %c0_69] : memref<2x8xf32, #tpu.memory_space<vmem>>, vector<2x8xf32>
    tpu.vector_store %arg10[%c0_68, %c0_69], %130 {strides = array<i32>} : memref<2x8xf32, #tpu.memory_space<vmem>>, vector<2x8xf32>,
    return
  }
  func.func @transform_0(%arg0: i32, %arg1: memref<16xi32, #tpu.memory_space<smem>>) -> (i32, i32) {
    %c0_i32 = arith.constant 0 : i32
    %c0_i32_0 = arith.constant 0 : i32
    %c0_i32_1 = arith.constant 0 : i32
    return %c0_i32, %c0_i32_0 : i32, i32
  }
  func.func @transform_1(%arg0: i32, %arg1: memref<16xi32, #tpu.memory_space<smem>>) -> (i32, i32) {
    %c0_i32 = arith.constant 0 : i32
    %c0_i32_0 = arith.constant 0 : i32
    %c0_i32_1 = arith.constant 0 : i32
    return %c0_i32, %c0_i32_0 : i32, i32
  }
  func.func @transform_2(%arg0: i32, %arg1: memref<16xi32, #tpu.memory_space<smem>>) -> (i32, i32) {
    %c0_i32 = arith.constant 0 : i32
    %c0_i32_0 = arith.constant 0 : i32
    %c0_i32_1 = arith.constant 0 : i32
    return %c0_i32, %c0_i32_0 : i32, i32
  }
  func.func @transform_3(%arg0: i32, %arg1: memref<16xi32, #tpu.memory_space<smem>>) -> (i32, i32) {
    %c0_i32 = arith.constant 0 : i32
    %c0_i32_0 = arith.constant 0 : i32
    %c0_i32_1 = arith.constant 0 : i32
    return %c0_i32, %c0_i32_0 : i32, i32
  }
  func.func @transform_4(%arg0: i32, %arg1: memref<16xi32, #tpu.memory_space<smem>>) -> (i32, i32) {
    %c0_i32 = arith.constant 0 : i32
    %c0_i32_0 = arith.constant 0 : i32
    %c0_i32_1 = arith.constant 0 : i32
    return %c0_i32, %c0_i32_0 : i32, i32
  }
  func.func @transform_5(%arg0: i32, %arg1: memref<16xi32, #tpu.memory_space<smem>>) -> (i32, i32) {
    %c0_i32 = arith.constant 0 : i32
    %c0_i32_0 = arith.constant 0 : i32
    %c0_i32_1 = arith.constant 0 : i32
    return %c0_i32, %c0_i32_0 : i32, i32
  }
  func.func @transform_6(%arg0: i32, %arg1: memref<16xi32, #tpu.memory_space<smem>>) -> (i32, i32) {
    %c0_i32 = arith.constant 0 : i32
    %c0_i32_0 = arith.constant 0 : i32
    %c0_i32_1 = arith.constant 0 : i32
    return %c0_i32, %c0_i32_0 : i32, i32
  }
  func.func @transform_7(%arg0: i32, %arg1: memref<16xi32, #tpu.memory_space<smem>>) -> (i32, i32) {
    %c0_i32 = arith.constant 0 : i32
    %c0_i32_0 = arith.constant 0 : i32
    %c0_i32_1 = arith.constant 0 : i32
    return %c0_i32, %c0_i32_0 : i32, i32
  }
  func.func @transform_8(%arg0: i32, %arg1: memref<16xi32, #tpu.memory_space<smem>>) -> (i32, i32) {
    %c0_i32 = arith.constant 0 : i32
    %c0_i32_0 = arith.constant 0 : i32
    %c0_i32_1 = arith.constant 0 : i32
    return %c0_i32, %c0_i32_0 : i32, i32
  }
}

</mosaic_0001>

<bundles_post_ra>
// kernel: tpu_custom_call.1
= control target key start
LH: loop header
LB: loop body
LE: loop exit
PB: predicated region body
PF: predicated region fallthrough
CT: control target
= control target key end

     0   :  { %s1701_s0 = inlined_call_operand.vmem [shape: s32[16], index: 0, kind: input, shape index: {}]   ;;  %s1702_s1 = inlined_call_operand.vmem [shape: f32[30,16], index: 1, kind: input, shape index: {}]   ;;  %s1703_s2 = inlined_call_operand.vmem [shape: f32[1,16], index: 2, kind: input, shape index: {}]   ;;  %s1704_s3 = inlined_call_operand.vmem [shape: f32[1,16], index: 3, kind: input, shape index: {}]   ;;  %s1705_s4 = inlined_call_operand.vmem [shape: f32[16,32], index: 4, kind: input, shape index: {}]   ;;  %s1706_s5 = inlined_call_operand.vmem [shape: f32[32,32], index: 5, kind: input, shape index: {}]   ;;  %s1707_s6 = inlined_call_operand.vmem [shape: f32[1,32], index: 6, kind: input, shape index: {}]   ;;  %s1708_s7 = inlined_call_operand.vmem [shape: f32[32,8], index: 7, kind: input, shape index: {}]   ;;  %s1709_s8 = inlined_call_operand.vmem [shape: f32[1,8], index: 8, kind: input, shape index: {}]   ;;  %s1710_s9 = inlined_call_operand.hbm [shape: f32[2,8], index: 9, kind: output, shape index: {}]  }
   0x1   :  { %s14_s11 = sshll.u32 %s1701_s0, 4  ;;  %s15_s11 = int_to_ptr.vmem [resolvable:$true] %s14_s11 }
   0x2   :  { %s1317_s12 = scalar_lea.vmem %s15_s11, 16  ;;  %p1322_p1 = scmp.lt.s32.totalorder %s15_s11, %s15_s11 }
   0x3   :  { %p1318_p0 = scmp.ne.s32.totalorder %s15_s11, %s1317_s12  ;;  %p1323_p2 = scmp.lt.s32.totalorder %s1317_s12, %s1317_s12 }
   0x5   :  { %p1324_p3 = por %p1323_p2, %p1322_p1 }
   0x7   :  { %p1325_p4 = pnand %p1324_p3, %p1318_p0 }
   0x9   :  { %1328 = shalt.err (!%p1325_p4)  }
   0xa   :  { %s1355_s13 = smov [#allocation4]  }
   0xb   :  { %17 = dma.vmem_to_smem %s15_s11, 16, %s1355_s13, [#allocation3] }
   0xc   :  { %1351 = dma.done.wait [#allocation3], 16 }
   0xd   :  { %1352 = vsyncadd [#allocation3], 4294967280 }
   0xe   :  { %19 = sfence }
   0xf   :  { %vm37_vm0 = vcmask 130048   ;;  %s46_s14 = sld [smem:[#allocation4]]  ;;  %v1356_v0 = vmov 0.0   ;;  %s1040_s15 = sld [smem:[#allocation4 + $0x1]] }
  0x10   :  { %38 = vst.msk [vmem:[#allocation2] sm:$0xff] %vm37_vm0, %v1356_v0  ;;  %s1039_s0 = sld [smem:[#allocation4 + $0x8]]  ;;  %39 = vst.msk [vmem:[#allocation2 + $0x8] sm:$0xff] %vm37_vm0, %v1356_v0 }
  0x11   :  { %40 = vst.msk [vmem:[#allocation2 + $0x10] sm:$0xff] %vm37_vm0, %v1356_v0  ;;  %41 = vst.msk [vmem:[#allocation2 + $0x18] sm:$0xff] %vm37_vm0, %v1356_v0 }
  0x12   :  { %42 = vst.msk [vmem:[#allocation2 + $0x20] sm:$0xff] %vm37_vm0, %v1356_v0  ;;  %43 = vst.msk [vmem:[#allocation2 + $0x28] sm:$0xff] %vm37_vm0, %v1356_v0 }
  0x13   :  { %44 = vst.msk [vmem:[#allocation2 + $0x30] sm:$0xff] %vm37_vm0, %v1356_v0  ;;  %45 = vst.msk [vmem:[#allocation2 + $0x38] sm:$0xff] %vm37_vm0, %v1356_v0 }
  0x14   :  { %20 = vsyncpa [#allocation6], 0  ;;  %s1041_s16 = sld [smem:[#allocation4 + $0x9]]  ;;  %vm49_vm1 = vcmask 122880   ;;  %s1042_s29 = sld [smem:[#allocation4 + $0x2]]  ;;  %v254_v27 = vld [vmem:[%s1705_s4] sm:$0xff] }
  0x15   :  { %s47_s19 = scalar_lea.vmem %s1702_s1, %s46_s14  ;;  %s56_s25 = scalar_lea.vmem %s1702_s1, %s1040_s15  ;;  %v255_v28 = vld [vmem:[%s1705_s4 + $0x8] sm:$0xff]  ;;  %v1532_v55 = vld [vmem:[%s1703_s2] ss:$0 sm:$0xff]  ;;  %vm1358_vm2 = vmmov 0   ;;  %vm397_vm3 = vcmask 261120   ;;  %vm1007_vm4 = vcmask 58368  }
  0x16   :  { %v48_v1 = vld [vmem:[%s47_s19] sm:$0x1]  ;;  %s52_s22 = scalar_lea.vmem %s1702_s1, %s1039_s0  ;;  %s1043_s30 = sld [smem:[#allocation4 + $0xa]]  ;;  %v1228_v29 = vpack.c.bf16 %v255_v28, %v254_v27  ;;  %1148 = vmatprep.mubr.msk.f32.mxu1 %vm1358_vm2, %v1356_v0 }
  0x17   :  { %50 = vst.msk [vmem:[#allocation2] sm:$0x1] %vm49_vm1, %v48_v1  ;;  %v53_v2 = vld [vmem:[%s52_s22] sm:$0x1]  ;;  %s1044_s15 = sld [smem:[#allocation4 + $0x3]]  ;;  %s1046_s27 = sld [smem:[#allocation4 + $0x4]] }
  0x18   :  { %v57_v3 = vld [vmem:[%s56_s25] sm:$0x1]  ;;  %54 = vst.msk [vmem:[#allocation2 + $0x1] sm:$0x1] %vm49_vm1, %v53_v2  ;;  %1229 = vmatprep.subr.bf16.mxu0 %v1228_v29  ;;  %s1050_s10 = sld [smem:[#allocation4 + $0x6]]  ;;  %s1053_s13 = sld [smem:[#allocation4 + $0xf]] }
  0x19   :  { %58 = vst.msk [vmem:[#allocation2 + $0x8] sm:$0x1] %vm49_vm1, %v57_v3  ;;  %1231 = vmatpush3.bf16.msra.mxu0 %v1228_v29  ;;  %s1051_s11 = sld [smem:[#allocation4 + $0xe]]  ;;  %v1538_v58 = vld [vmem:[%s1704_s3] ss:$0 sm:$0xff] }
  0x1a   :  { %s60_s28 = scalar_lea.vmem %s1702_s1, %s1041_s16  ;;  %s64_s12 = scalar_lea.vmem %s1702_s1, %s1042_s29 }
  0x1b   :  { %v61_v4 = vld [vmem:[%s60_s28] sm:$0x1]  ;;  %s1045_s16 = sld [smem:[#allocation4 + $0xb]]  ;;  %s1047_s28 = sld [smem:[#allocation4 + $0xc]] }
  0x1c   :  { %62 = vst.msk [vmem:[#allocation2 + $0x9] sm:$0x1] %vm49_vm1, %v61_v4  ;;  %s68_s0 = scalar_lea.vmem %s1702_s1, %s1043_s30  ;;  %v65_v9 = vld [vmem:[%s64_s12] sm:$0x1]  ;;  %s1048_s29 = sld [smem:[#allocation4 + $0x5]] }
  0x1d   :  { %v69_v10 = vld [vmem:[%s68_s0] sm:$0x1]  ;;  %66 = vst.msk [vmem:[#allocation2 + $0x10] sm:$0x1] %vm49_vm1, %v65_v9  ;;  %s72_s19 = scalar_lea.vmem %s1702_s1, %s1044_s15  ;;  %s1049_s30 = sld [smem:[#allocation4 + $0xd]] }
  0x1e   :  { %70 = vst.msk [vmem:[#allocation2 + $0x11] sm:$0x1] %vm49_vm1, %v69_v10  ;;  %v73_v23 = vld [vmem:[%s72_s19] sm:$0x1]  ;;  %s1052_s12 = sld [smem:[#allocation4 + $0x7]]  ;;  %s80_s0 = scalar_lea.vmem %s1702_s1, %s1046_s27  ;;  %v393_v10 = vld [vmem:[%s1706_s5 + $0x8] sm:$0xff] }
  0x1f   :  { %v111_v5 = vld [vmem:[#allocation2] sm:$0xff]  ;;  %74 = vst.msk [vmem:[#allocation2 + $0x18] sm:$0x1] %vm49_vm1, %v73_v23  ;;  %s96_s26 = scalar_lea.vmem %s1702_s1, %s1050_s10  ;;  %s100_s14 = scalar_lea.vmem %s1702_s1, %s1051_s11 }
  0x20   :  { %v119_v6 = vsel %vm37_vm0, %v111_v5, 0.0  ;;  %v81_v35 = vld [vmem:[%s80_s0] sm:$0x1] }
  0x21   :  { %120 = vadd.xlane.f32.xlu0 %v119_v6  ;;  %s76_s22 = scalar_lea.vmem %s1702_s1, %s1045_s16  ;;  %s84_s17 = scalar_lea.vmem %s1702_s1, %s1047_s28  ;;  %82 = vst.msk [vmem:[#allocation2 + $0x20] sm:$0x1] %vm49_vm1, %v81_v35  ;;  %v97_v39 = vld [vmem:[%s96_s26] sm:$0x1] }
  0x22   :  { %v77_v24 = vld [vmem:[%s76_s22] sm:$0x1]  ;;  %s88_s20 = scalar_lea.vmem %s1702_s1, %s1048_s29  ;;  %s108_s16 = scalar_lea.vmem %s1702_s1, %s1053_s13  ;;  %98 = vst.msk [vmem:[#allocation2 + $0x30] sm:$0x1] %vm49_vm1, %v97_v39 }
  0x23   :  { %v112_v7 = vld [vmem:[#allocation2 + $0x8] sm:$0xff]  ;;  %78 = vst.msk [vmem:[#allocation2 + $0x19] sm:$0x1] %vm49_vm1, %v77_v24  ;;  %v85_v36 = vld [vmem:[%s84_s17] sm:$0x1]  ;;  %s92_s23 = scalar_lea.vmem %s1702_s1, %s1049_s30 }
  0x24   :  { %v122_v8 = vsel %vm37_vm0, %v112_v7, 0.0  ;;  %86 = vst.msk [vmem:[#allocation2 + $0x21] sm:$0x1] %vm49_vm1, %v85_v36  ;;  %v89_v37 = vld [vmem:[%s88_s20] sm:$0x1]  ;;  %s104_s4 = scalar_lea.vmem %s1702_s1, %s1052_s12 }
  0x25   :  { %123 = vadd.xlane.f32.xlu0 %v122_v8  ;;  %v113_v11 = vld [vmem:[#allocation2 + $0x10] sm:$0xff]  ;;  %v93_v38 = vld [vmem:[%s92_s23] sm:$0x1]  ;;  %90 = vst.msk [vmem:[#allocation2 + $0x28] sm:$0x1] %vm49_vm1, %v89_v37 }
  0x26   :  { %v125_v12 = vsel %vm37_vm0, %v113_v11, 0.0  ;;  %94 = vst.msk [vmem:[#allocation2 + $0x29] sm:$0x1] %vm49_vm1, %v93_v38  ;;  %v101_v40 = vld [vmem:[%s100_s14] sm:$0x1] }
  0x27   :  { %102 = vst.msk [vmem:[#allocation2 + $0x31] sm:$0x1] %vm49_vm1, %v101_v40  ;;  %v105_v41 = vld [vmem:[%s104_s4] sm:$0x1]  ;;  %s1359_s4 = smov [#allocation5]  }
  0x28   :  { %v109_v42 = vld [vmem:[%s108_s16] sm:$0x1]  ;;  %106 = vst.msk [vmem:[#allocation2 + $0x38] sm:$0x1] %vm49_vm1, %v105_v41 }
  0x29   :  { %126 = vadd.xlane.f32.xlu0 %v125_v12  ;;  %110 = vst.msk [vmem:[#allocation2 + $0x39] sm:$0x1] %vm49_vm1, %v109_v42  ;;  %v392_v9 = vld [vmem:[%s1706_s5] sm:$0xff]  ;;  %v1357_v12 = vmov 0.0|0.0  }
  0x2a   :  { %v1474_v25 = vld [vmem:[#allocation2 + $0x18] sm:$0xff]  ;;  %1232 = vmatprep.subr.bf16.mxu1 %v1357_v12  ;;  %1244 = vmatprep.subr.bf16.mxu0 %v1357_v12 }
  0x2b   :  { %v128_v26 = vsel %vm37_vm0, %v1474_v25, 0.0  ;;  %v1521_v43 = vld [vmem:[#allocation2 + $0x20] sm:$0xff] }
  0x2c   :  { %v131_v44 = vsel %vm37_vm0, %v1521_v43, 0.0 }
  0x2d   :  { %v116_v2 = vld [vmem:[#allocation2 + $0x28] sm:$0xff] }
  0x2e   :  { %v1525_v45 = vld [vmem:[#allocation2 + $0x30] sm:$0xff] }
  0x2f   :  { %v137_v46 = vsel %vm37_vm0, %v1525_v45, 0.0 }
  0xae   :  { %v121_v13 = vpop.xlane.xlu0 %120 }
  0xaf   :  { %v144_v14 = vmul.f32 0.0625, %v121_v13  ;;  %v1565_v13 = vpack.c.bf16 %v393_v10, %v392_v9 }
  0xb1   :  { %v1456_v15 = vsub.f32 %v111_v5, %v144_v14  ;;  %v134_v5 = vsel %vm37_vm0, %v116_v2, 0.0  ;;  %v395_v14 = vld [vmem:[%s1706_s5 + $0x18] sm:$0xff]  ;;  %1234 = vmatpush3.bf16.msra.mxu1 %v1565_v13 }
  0xb2   :  { %v124_v16 = vpop.xlane.xlu0 %123  ;;  %1235 = vmatprep.subr.bf16.mxu1 %v1357_v12 }
  0xb3   :  { %v145_v17 = vmul.f32 0.0625, %v124_v16  ;;  %v160_v18 = vmul.f32 %v1456_v15, %v1456_v15 }
  0xb5   :  { %v1460_v19 = vsub.f32 %v112_v7, %v145_v17  ;;  %v168_v20 = vsel %vm37_vm0, %v160_v18, 0.0  ;;  %v118_v7 = vld [vmem:[#allocation2 + $0x38] sm:$0xff] }
  0xb6   :  { %169 = vadd.xlane.f32.xlu1 %v168_v20  ;;  %v127_v30 = vpop.xlane.xlu0 %126  ;;  %v140_v8 = vsel %vm37_vm0, %v118_v7, 0.0 }
  0xb7   :  { %v161_v21 = vmul.f32 %v1460_v19, %v1460_v19  ;;  %v146_v31 = vmul.f32 0.0625, %v127_v30 }
  0xb9   :  { %v171_v22 = vsel %vm37_vm0, %v161_v21, 0.0  ;;  %v1484_v32 = vsub.f32 %v113_v11, %v146_v31  ;;  %v394_v11 = vld [vmem:[%s1706_s5 + $0x10] sm:$0xff] }
  0xba   :  { %172 = vadd.xlane.f32.xlu1 %v171_v22 }
  0xbb   :  { %v162_v33 = vmul.f32 %v1484_v32, %v1484_v32 }
  0xbd   :  { %v174_v34 = vsel %vm37_vm0, %v162_v33, 0.0 }
  0xbe   :  { %129 = vadd.xlane.f32.xlu1 %v128_v26  ;;  %175 = vadd.xlane.f32.xlu0 %v174_v34 }
  0xc2   :  { %132 = vadd.xlane.f32.xlu0 %v131_v44 }
  0xc6   :  { %138 = vadd.xlane.f32.xlu0 %v137_v46 }
 0x143   :  { %v170_v47 = vpop.xlane.xlu1 %169 }
 0x144   :  { %v192_v48 = vmul.f32 0.0625, %v170_v47 }
 0x146   :  { %v200_v49 = vadd.f32 1e-05, %v192_v48 }
 0x147   :  { %v173_v50 = vpop.xlane.xlu1 %172 }
 0x148   :  { %1285 = vrsqrt.f32 %v200_v49  ;;  %v193_v51 = vmul.f32 0.0625, %v173_v50  ;;  %v1608_v50 = vld [vmem:[%s1707_s6] ss:$0 sm:$0xff] }
 0x14a   :  { %v201_v52 = vadd.f32 1e-05, %v193_v51 }
 0x14b   :  { %v130_v53 = vpop.xlane.xlu1 %129  ;;  %v176_v16 = vpop.xlane.xlu0 %175 }
 0x14c   :  { %1287 = vrsqrt.f32 %v201_v52  ;;  %v147_v56 = vmul.f32 0.0625, %v130_v53  ;;  %v194_v17 = vmul.f32 0.0625, %v176_v16 }
 0x14e   :  { %v1541_v59 = vsub.f32 %v1474_v25, %v147_v56  ;;  %v202_v18 = vadd.f32 1e-05, %v194_v17 }
 0x150   :  { %v163_v62 = vmul.f32 %v1541_v59, %v1541_v59  ;;  %1289 = vrsqrt.f32 %v202_v18 }
 0x152   :  { %v1286_v54 = vpop.eup %1285  ;;  %v177_v3 = vsel %vm37_vm0, %v163_v62, 0.0 }
 0x153   :  { %v216_v57 = vmul.f32 %v1286_v54, %v1456_v15  ;;  %178 = vadd.xlane.f32.xlu1 %v177_v3  ;;  %v1574_v15 = vpack.c.bf16 %v395_v14, %v394_v11 }
 0x155   :  { %v231_v60 = vmul.f32 %v1532_v55, %v216_v57  ;;  %1237 = vmatpush3.bf16.msra.mxu1 %v1574_v15 }
 0x156   :  { %v1288_v61 = vpop.eup %1287  ;;  %1238 = vmatprep.subr.bf16.mxu1 %v1357_v12 }
 0x157   :  { %v246_v63 = vadd.f32 %v1538_v58, %v231_v60  ;;  %v217_v1 = vmul.f32 %v1288_v61, %v1460_v19  ;;  %135 = vadd.xlane.f32.xlu1 %v134_v5  ;;  %v133_v19 = vpop.xlane.xlu0 %132 }
 0x158   :  { %v148_v20 = vmul.f32 0.0625, %v133_v19 }
 0x159   :  { %1128 = vmatprep.mubr.msk.f32.mxu0 %vm37_vm0, %v246_v63  ;;  %v232_v4 = vmul.f32 %v1532_v55, %v217_v1 }
 0x15a   :  { %v1584_v21 = vsub.f32 %v1521_v43, %v148_v20  ;;  %v1290_v28 = vpop.eup %1289 }
 0x15b   :  { %v247_v6 = vadd.f32 %v1538_v58, %v232_v4  ;;  %141 = vadd.xlane.f32.xlu1 %v140_v8  ;;  %v139_v22 = vpop.xlane.xlu0 %138  ;;  %v218_v30 = vmul.f32 %v1290_v28, %v1484_v32 }
 0x15c   :  { %v150_v23 = vmul.f32 0.0625, %v139_v22  ;;  %v164_v24 = vmul.f32 %v1584_v21, %v1584_v21 }
 0x15d   :  { %1129 = vmatmul.mubr.msk.f32.vlgmr.msra.gmra.mrb[0].mxu0 %vm37_vm0, %v247_v6  ;;  %v233_v31 = vmul.f32 %v1532_v55, %v218_v30 }
 0x15e   :  { %1246 = vmatpush3.bf16.msra.mxu0 %v1565_v13  ;;  %v1589_v25 = vsub.f32 %v1525_v45, %v150_v23  ;;  %v180_v26 = vsel %vm37_vm0, %v164_v24, 0.0 }
 0x15f   :  { %1247 = vmatprep.subr.bf16.mxu0 %v1357_v12  ;;  %181 = vadd.xlane.f32.xlu0 %v180_v26  ;;  %v248_v33 = vadd.f32 %v1538_v58, %v233_v31 }
 0x160   :  { %v166_v27 = vmul.f32 %v1589_v25, %v1589_v25 }
 0x161   :  { %1131 = vmatprep.mubr.msk.f32.mxu0 %vm37_vm0, %v248_v33 }
 0x162   :  { %1249 = vmatpush3.bf16.msra.mxu0 %v1574_v15  ;;  %v186_v29 = vsel %vm37_vm0, %v166_v27, 0.0 }
 0x163   :  { %1256 = vmatprep.subr.bf16.mxu0 %v1357_v12  ;;  %187 = vadd.xlane.f32.xlu0 %v186_v29 }
 0x1e0   :  { %v179_v34 = vpop.xlane.xlu1 %178 }
 0x1e1   :  { %v195_v35 = vmul.f32 0.0625, %v179_v34 }
 0x1e3   :  { %v203_v36 = vadd.f32 1e-05, %v195_v35 }
 0x1e4   :  { %v136_v37 = vpop.xlane.xlu1 %135 }
 0x1e5   :  { %1291 = vrsqrt.f32 %v203_v36  ;;  %v149_v38 = vmul.f32 0.0625, %v136_v37 }
 0x1e7   :  { %v157_v39 = vsub.f32 %v116_v2, %v149_v38 }
 0x1e8   :  { %v142_v40 = vpop.xlane.xlu1 %141 }
 0x1e9   :  { %v151_v41 = vmul.f32 0.0625, %v142_v40  ;;  %v165_v42 = vmul.f32 %v157_v39, %v157_v39 }
 0x1eb   :  { %v159_v43 = vsub.f32 %v118_v7, %v151_v41  ;;  %v183_v32 = vsel %vm37_vm0, %v165_v42, 0.0 }
 0x1ec   :  { %184 = vadd.xlane.f32.xlu1 %v183_v32  ;;  %v182_v56 = vpop.xlane.xlu0 %181 }
 0x1ed   :  { %v167_v44 = vmul.f32 %v159_v43, %v159_v43 }
 0x1ef   :  { %v1292_v45 = vpop.eup %1291  ;;  %v189_v46 = vsel %vm37_vm0, %v167_v44, 0.0 }
 0x1f0   :  { %v219_v47 = vmul.f32 %v1292_v45, %v1541_v59  ;;  %190 = vadd.xlane.f32.xlu1 %v189_v46  ;;  %v196_v59 = vmul.f32 0.0625, %v182_v56  ;;  %v188_v63 = vpop.xlane.xlu0 %187 }
 0x1f1   :  { %v198_v2 = vmul.f32 0.0625, %v188_v63  ;;  %v926_v63 = vld [vmem:[%s1708_s7 + $0x18] sm:$0xff] }
 0x1f2   :  { %v234_v48 = vmul.f32 %v1532_v55, %v219_v47  ;;  %v204_v61 = vadd.f32 1e-05, %v196_v59 }
 0x1f3   :  { %v206_v4 = vadd.f32 1e-05, %v198_v2 }
 0x1f4   :  { %v249_v49 = vadd.f32 %v1538_v58, %v234_v48 }
 0x1f6   :  { %1132 = vmatmul.mubr.msk.f32.gmra.mrb[2].mxu0 %vm37_vm0, %v249_v49 }
 0x230   :  { %v1130_v51 = vpop.f32.mrb[0].mxu0 }
 0x231   :  { %v353_v52 = vpop.f32.mrb[1].mxu0  ;;  %v359_v27 = vadd.f32 %v1130_v51, %v1608_v50 }
 0x232   :  { %v354_v53 = vadd.f32 %v1608_v50, %v353_v52 }
 0x234   :  { %1293 = vtanh.f32 %v354_v53 }
 0x235   :  { %1295 = vrsqrt.f32 %v204_v61  ;;  %v924_v61 = vld [vmem:[%s1708_s7 + $0x8] sm:$0xff] }
 0x23e   :  { %v1294_v54 = vpop.eup %1293 }
 0x23f   :  { %1149 = vmatmul.mubr.msk.f32.vlgmr.msra.gmra.mrb[0].mxu1 %vm397_vm3, %v1294_v54  ;;  %v1296_v6 = vpop.eup %1295 }
 0x240   :  { %1240 = vmatpush3.bf16.msra.mxu1 %v1565_v13  ;;  %1159 = vmatprep.mubr.msk.f32.mxu1 %vm1358_vm2, %v1356_v0  ;;  %v220_v8 = vmul.f32 %v1296_v6, %v1584_v21 }
 0x241   :  { %1241 = vmatprep.subr.bf16.mxu1 %v1357_v12 }
 0x242   :  { %v235_v10 = vmul.f32 %v1532_v55, %v220_v8 }
 0x244   :  { %1243 = vmatpush3.bf16.msra.mxu1 %v1574_v15  ;;  %v250_v17 = vadd.f32 %v1538_v58, %v235_v10 }
 0x245   :  { %1250 = vmatprep.subr.bf16.mxu1 %v1357_v12 }
 0x246   :  { %1134 = vmatprep.mubr.msk.f32.mxu0 %vm37_vm0, %v250_v17 }
 0x279   :  { %v185_v57 = vpop.xlane.xlu1 %184 }
 0x27a   :  { %v197_v60 = vmul.f32 0.0625, %v185_v57 }
 0x27c   :  { %v205_v62 = vadd.f32 1e-05, %v197_v60 }
 0x27d   :  { %v191_v1 = vpop.xlane.xlu1 %190 }
 0x27e   :  { %v199_v3 = vmul.f32 0.0625, %v191_v1  ;;  %1297 = vrsqrt.f32 %v205_v62 }
 0x27f   :  { %1299 = vrsqrt.f32 %v206_v4 }
 0x280   :  { %v207_v5 = vadd.f32 1e-05, %v199_v3 }
 0x282   :  { %1301 = vrsqrt.f32 %v207_v5 }
 0x288   :  { %v1298_v7 = vpop.eup %1297 }
 0x289   :  { %v221_v9 = vmul.f32 %v1298_v7, %v157_v39  ;;  %v1300_v11 = vpop.eup %1299  ;;  %v1072_v7 = vld [vmem:[%s1709_s8] ss:$0 sm:$0xff] }
 0x28a   :  { %v222_v18 = vmul.f32 %v1300_v11, %v1589_v25 }
 0x28b   :  { %v236_v14 = vmul.f32 %v1532_v55, %v221_v9 }
 0x28c   :  { %v1302_v16 = vpop.eup %1301  ;;  %v237_v22 = vmul.f32 %v1532_v55, %v222_v18 }
 0x28d   :  { %v251_v19 = vadd.f32 %v1538_v58, %v236_v14  ;;  %v223_v20 = vmul.f32 %v1302_v16, %v159_v43 }
 0x28e   :  { %v252_v23 = vadd.f32 %v1538_v58, %v237_v22 }
 0x28f   :  { %1135 = vmatmul.mubr.msk.f32.gmra.mrb[4].mxu0 %vm37_vm0, %v251_v19  ;;  %v238_v21 = vmul.f32 %v1532_v55, %v223_v20 }
 0x290   :  { %1137 = vmatprep.mubr.msk.f32.mxu0 %vm37_vm0, %v252_v23 }
 0x291   :  { %v253_v24 = vadd.f32 %v1538_v58, %v238_v21 }
 0x293   :  { %1138 = vmatmul.mubr.msk.f32.gmra.mrb[6].mxu0 %vm37_vm0, %v253_v24 }
 0x294   :  { %1170 = vmatprep.mubr.msk.f32.mxu0 %vm1358_vm2, %v1356_v0 }
 0x2c9   :  { %v1133_v25 = vpop.f32.mrb[2].mxu0 }
 0x2ca   :  { %v363_v26 = vpop.f32.mrb[3].mxu0  ;;  %v369_v40 = vadd.f32 %v1133_v25, %v1608_v50 }
 0x2cb   :  { %v364_v35 = vadd.f32 %v1608_v50, %v363_v26 }
 0x312   :  { %v467_v28 = vpop.f32.mrb[0].mxu1 }
 0x313   :  { %v471_v29 = vadd.f32 %v467_v28, %v359_v27  ;;  %v1150_v30 = vpop.f32.mrb[1].mxu1 }
 0x315   :  { %1303 = vtanh.f32 %v471_v29 }
 0x31f   :  { %v1304_v55 = vpop.eup %1303 }
 0x320   :  { %1160 = vmatmul.mubr.msk.f32.vlgmr.msra.gmra.mrb[2].mxu1 %vm397_vm3, %v1304_v55 }
 0x321   :  { %1252 = vmatpush3.bf16.msra.mxu1 %v1565_v13  ;;  %1181 = vmatprep.mubr.msk.f32.mxu1 %vm1358_vm2, %v1356_v0 }
 0x322   :  { %1253 = vmatprep.subr.bf16.mxu1 %v1357_v12 }
 0x325   :  { %1255 = vmatpush3.bf16.msra.mxu1 %v1574_v15 }
 0x326   :  { %1262 = vmatprep.subr.bf16.mxu1 %v1357_v12 }
 0x362   :  { %v1136_v58 = vpop.f32.mrb[4].mxu0 }
 0x363   :  { %v373_v31 = vpop.f32.mrb[5].mxu0  ;;  %v379_v49 = vadd.f32 %v1136_v58, %v1608_v50 }
 0x364   :  { %v374_v44 = vadd.f32 %v1608_v50, %v373_v31 }
 0x366   :  { %v1139_v33 = vpop.f32.mrb[6].mxu0 }
 0x367   :  { %v383_v34 = vpop.f32.mrb[7].mxu0  ;;  %v389_v2 = vadd.f32 %v1139_v33, %v1608_v50 }
 0x3f3   :  { %v542_v36 = vpop.f32.mrb[2].mxu1 }
 0x3f4   :  { %v546_v37 = vadd.f32 %v542_v36, %v364_v35  ;;  %v1161_v38 = vpop.f32.mrb[3].mxu1 }
 0x3f6   :  { %1305 = vtanh.f32 %v546_v37 }
 0x400   :  { %v1306_v39 = vpop.eup %1305 }
 0x401   :  { %1171 = vmatmul.mubr.msk.f32.vlgmr.msra.gmra.mrb[8].mxu0 %vm397_vm3, %v1306_v39 }
 0x402   :  { %1258 = vmatpush3.bf16.msra.mxu0 %v1565_v13  ;;  %1192 = vmatprep.mubr.msk.f32.mxu0 %vm1358_vm2, %v1356_v0 }
 0x403   :  { %1259 = vmatprep.subr.bf16.mxu0 %v1357_v12 }
 0x406   :  { %1261 = vmatpush3.bf16.msra.mxu0 %v1574_v15 }
 0x407   :  { %1268 = vmatprep.subr.bf16.mxu0 %v1357_v12 }
 0x4d4   :  { %v617_v41 = vpop.f32.mrb[8].mxu0 }
 0x4d5   :  { %v621_v42 = vadd.f32 %v617_v41, %v369_v40  ;;  %v1172_v43 = vpop.f32.mrb[9].mxu0 }
 0x4d7   :  { %1307 = vtanh.f32 %v621_v42 }
 0x4e1   :  { %v1308_v32 = vpop.eup %1307 }
 0x4e2   :  { %1182 = vmatmul.mubr.msk.f32.vlgmr.msra.gmra.mrb[4].mxu1 %vm397_vm3, %v1308_v32 }
 0x4e3   :  { %1264 = vmatpush3.bf16.msra.mxu1 %v1565_v13  ;;  %1203 = vmatprep.mubr.msk.f32.mxu1 %vm1358_vm2, %v1356_v0 }
 0x4e4   :  { %1265 = vmatprep.subr.bf16.mxu1 %v1357_v12 }
 0x4e7   :  { %1267 = vmatpush3.bf16.msra.mxu1 %v1574_v15 }
 0x4e8   :  { %1274 = vmatprep.subr.bf16.mxu1 %v1357_v12 }
 0x5b5   :  { %v692_v45 = vpop.f32.mrb[4].mxu1 }
 0x5b6   :  { %v696_v46 = vadd.f32 %v692_v45, %v374_v44  ;;  %v1183_v47 = vpop.f32.mrb[5].mxu1 }
 0x5b8   :  { %1309 = vtanh.f32 %v696_v46 }
 0x5c2   :  { %v1310_v48 = vpop.eup %1309 }
 0x5c3   :  { %1193 = vmatmul.mubr.msk.f32.vlgmr.msra.gmra.mrb[10].mxu0 %vm397_vm3, %v1310_v48 }
 0x5c4   :  { %1270 = vmatpush3.bf16.msra.mxu0 %v1565_v13  ;;  %1214 = vmatprep.mubr.msk.f32.mxu0 %vm1358_vm2, %v1356_v0  ;;  %v384_v13 = vadd.f32 %v1608_v50, %v383_v34 }
 0x5c5   :  { %1271 = vmatprep.subr.bf16.mxu0 %v1357_v12 }
 0x5c8   :  { %1273 = vmatpush3.bf16.msra.mxu0 %v1574_v15  ;;  %v923_v15 = vld [vmem:[%s1708_s7] sm:$0xff] }
 0x5c9   :  { %v1275_v62 = vpack.c.bf16 %v924_v61, %v923_v15 }
 0x696   :  { %v767_v51 = vpop.f32.mrb[10].mxu0 }
 0x697   :  { %v771_v52 = vadd.f32 %v767_v51, %v379_v49  ;;  %v1194_v53 = vpop.f32.mrb[11].mxu0 }
 0x699   :  { %1311 = vtanh.f32 %v771_v52 }
 0x6a3   :  { %v1312_v54 = vpop.eup %1311 }
 0x6a4   :  { %1204 = vmatmul.mubr.msk.f32.vlgmr.msra.gmra.mrb[6].mxu1 %vm397_vm3, %v1312_v54 }
 0x6a5   :  { %1225 = vmatprep.mubr.msk.f32.mxu1 %vm1358_vm2, %v1356_v0  ;;  %v925_v0 = vld [vmem:[%s1708_s7 + $0x10] sm:$0xff]  ;;  %1276 = vmatpush3.bf16.msra.mxu1 %v1275_v62  ;;  %s1015_s7 = sshll.u32 %s1359_s4, 4  ;;  %s1016_s7 = int_to_ptr.vmem [resolvable:$true] %s1015_s7 }
 0x6a6   :  { %v1278_v1 = vpack.c.bf16 %v926_v63, %v925_v0  ;;  %1277 = vmatprep.subr.bf16.mxu1 %v1357_v12  ;;  %s1329_s0 = scalar_lea.vmem %s1016_s7, 32  ;;  %p1334_p6 = scmp.lt.s32.totalorder %s1016_s7, %s1016_s7 }
 0x6a7   :  { %p1330_p5 = scmp.ne.s32.totalorder %s1016_s7, %s1329_s0  ;;  %p1335_p7 = scmp.lt.s32.totalorder %s1329_s0, %s1329_s0 }
 0x6a9   :  { %1279 = vmatpush3.bf16.msra.mxu1 %v1278_v1  ;;  %p1336_p8 = por %p1335_p7, %p1334_p6 }
 0x6ab   :  { %p1337_p9 = pnand %p1336_p8, %p1330_p5 }
 0x777   :  { %v842_v56 = vpop.f32.mrb[6].mxu1 }
 0x778   :  { %v846_v57 = vadd.f32 %v842_v56, %v384_v13  ;;  %v1205_v59 = vpop.f32.mrb[7].mxu1 }
 0x77a   :  { %1313 = vtanh.f32 %v846_v57 }
 0x784   :  { %v1314_v60 = vpop.eup %1313 }
 0x785   :  { %1215 = vmatmul.mubr.msk.f32.vlgmr.msra.gmra.mrb[12].mxu0 %vm397_vm3, %v1314_v60 }
 0x858   :  { %v917_v3 = vpop.f32.mrb[12].mxu0 }
 0x859   :  { %v921_v4 = vadd.f32 %v917_v3, %v389_v2  ;;  %v1216_v5 = vpop.f32.mrb[13].mxu0 }
 0x85b   :  { %1315 = vtanh.f32 %v921_v4 }
 0x865   :  { %v1316_v6 = vpop.eup %1315 }
 0x866   :  { %1226 = vmatmul.mubr.msk.f32.vlgmr.msra.gmra.mrb[8].mxu1 %vm397_vm3, %v1316_v6 }
 0x939   :  { %v1003_v8 = vpop.f32.mrb[8].mxu1 }
 0x93a   :  { %v1004_v9 = vadd.f32 %v1072_v7, %v1003_v8  ;;  %v1227_v12 = vpop.f32.mrb[9].mxu1 }
 0x93c   :  { %1008 = vst.msk [vmem:[#allocation5] sm:$0x3] %vm1007_vm4, %v1004_v9 }
 0x93d   :  { %1340 = shalt.err (!%p1337_p9)
}
 0x93e   :  { %s1341_s1 = scalar_lea.hbm %s1710_s9, 32 }
 0x93f   :  { %p1342_p10 = scmp.ne.s32.totalorder %s1710_s9, %s1341_s1  ;;  %p1345_p11 = scmp.lt.u32.totalorder %s1341_s1, %s1710_s9 }
 0x941   :  { %p1347_p12 = pnand %p1345_p11, %p1342_p10 }
 0x943   :  { %1350 = shalt.err (!%p1347_p12)
}
 0x944   :  { %1018 = dma.vmem_to_hbm [thread:$0]  %s1016_s7, 32, %s1710_s9, [#allocation6]  }
 0x945   :  { %1353 = dma.done.wait [#allocation6], 32  }
 0x946   :  { %1354 = vsyncadd [#allocation6], 4294967264 }
 0x947   :  { %1022 = vsyncpa [#allocation6], 1 }

</bundles_post_ra>
